<compile_context>
chip_gen: v6e
topology: v6e:2x2x1
jax: 0.10.0
libtpu: 0.0.40
codegen_flags: <defaults>
</compile_context>

<pallas_src>
import functools

import jax
import jax.numpy as jnp
from jax.experimental import pallas as pl
from jax.experimental.pallas import tpu as pltpu


def _discrete_q_kernel(x_ref, w1_ref, b1_ref, w2_ref, b2_ref,
                       w3_ref, b3_ref, w4_ref, b4_ref, out_ref):
    f32 = jnp.float32
    wdt = w1_ref.dtype  # matmul operand dtype (f32 or bf16); accumulation is f32

    x = x_ref[...]
    h = jnp.dot(x, w1_ref[...], preferred_element_type=f32) + b1_ref[...]
    h = jnp.maximum(h, 0.0)

    h = jnp.dot(h.astype(wdt), w2_ref[...], preferred_element_type=f32) + b2_ref[...]
    h = jnp.maximum(h, 0.0)

    h = jnp.dot(h.astype(wdt), w3_ref[...], preferred_element_type=f32) + b3_ref[...]
    h = jnp.maximum(h, 0.0)

    q = jnp.dot(h.astype(wdt), w4_ref[...], preferred_element_type=f32) + b4_ref[...]
    out_ref[...] = q.astype(out_ref.dtype)  # lane-dense (tb, OUT_PAD) store


def _batch_tile(n):
    """Largest tile that evenly divides the batch (keeps blocks (8,128)-friendly
    for big batches, falls back to a single full-extent block for small ones)."""
    for tb in (512, 256, 128):
        if n % tb == 0:
            return tb
    return n


@functools.partial(jax.jit, static_argnames=("output_dim",))
def discrete_q_forward(state, params, *, output_dim):
    """state: (..., state_dim) -> q-values (..., output_dim)."""
    lead = state.shape[:-1]
    S = state.shape[-1]
    x = state.reshape(-1, S).astype(params["w1"].dtype)
    B = x.shape[0]
    H = params["w1"].shape[1]
    OUTP = params["w4"].shape[1]  # lane-padded output width (multiple of 128)

    tb = _batch_tile(B)
    grid = (pl.cdiv(B, tb),)
    full = lambda i: (0, 0)  # weights/biases: same whole block for every grid step

    q_pad = pl.pallas_call(
        _discrete_q_kernel,
        out_shape=jax.ShapeDtypeStruct((B, OUTP), jnp.float32),
        grid=grid,
        in_specs=[
            pl.BlockSpec((tb, S), lambda i: (i, 0)),   # state tile
            pl.BlockSpec((S, H), full),                # W1^T
            pl.BlockSpec((1, H), full),                # b1
            pl.BlockSpec((H, H), full),                # W2^T
            pl.BlockSpec((1, H), full),                # b2
            pl.BlockSpec((H, H), full),                # W3^T
            pl.BlockSpec((1, H), full),                # b3
            pl.BlockSpec((H, OUTP), full),             # W4^T (lane-padded)
            pl.BlockSpec((1, OUTP), full),             # b4   (lane-padded)
        ],
        out_specs=pl.BlockSpec((tb, OUTP), lambda i: (i, 0)),
        compiler_params=pltpu.CompilerParams(
            dimension_semantics=("parallel",),          # batch axis shards across TCs (v7x)
        ),
    )(x, params["w1"], params["b1"], params["w2"], params["b2"],
      params["w3"], params["b3"], params["w4"], params["b4"])

    q = q_pad[:, :output_dim]
    return q.reshape(lead + (output_dim,))


def init_params(key, state_dim, hidden_dim, output_dim, dtype=jnp.float32):
    """Mirror the nn.Module init: xavier_uniform_ weights, torch-default biases.

    Weights are stored transposed (in_dim, out_dim); the last layer's weight/bias
    are zero-padded along the output dim to a multiple of 128 lanes so the kernel
    writes a lane-dense output tile. Biases stay f32 (added after f32 accumulation)."""
    S, H, OUT = state_dim, hidden_dim, output_dim
    outp = 128 * ((OUT + 127) // 128)
    ks = jax.random.split(key, 8)

    def xavier(k, fan_in, fan_out):
        bound = float(jnp.sqrt(6.0 / (fan_in + fan_out)))
        return jax.random.uniform(k, (fan_in, fan_out), jnp.float32, -bound, bound)

    def bias(k, fan_in, width):
        bound = 1.0 / float(jnp.sqrt(fan_in))
        return jax.random.uniform(k, (1, width), jnp.float32, -bound, bound)

    w4 = xavier(ks[3], H, OUT)
    b4 = bias(ks[7], H, OUT)
    w4p = jnp.zeros((H, outp), jnp.float32).at[:, :OUT].set(w4)
    b4p = jnp.zeros((1, outp), jnp.float32).at[:, :OUT].set(b4)

    return {
        "w1": xavier(ks[0], S, H).astype(dtype),
        "b1": bias(ks[4], S, H),
        "w2": xavier(ks[1], H, H).astype(dtype),
        "b2": bias(ks[5], H, H),
        "w3": xavier(ks[2], H, H).astype(dtype),
        "b3": bias(ks[6], H, H),
        "w4": w4p.astype(dtype),
        "b4": b4p,
    }


def reference_forward(state, params, output_dim):
    """Pure-JAX f32 reference replicating the PyTorch forward (validation only)."""
    hi = jax.lax.Precision.HIGHEST
    x = state.astype(jnp.float32)
    h = jax.nn.relu(jnp.dot(x, params["w1"].astype(jnp.float32), precision=hi) + params["b1"])
    h = jax.nn.relu(jnp.dot(h, params["w2"].astype(jnp.float32), precision=hi) + params["b2"])
    h = jax.nn.relu(jnp.dot(h, params["w3"].astype(jnp.float32), precision=hi) + params["b3"])
    q = jnp.dot(h, params["w4"].astype(jnp.float32), precision=hi) + params["b4"]
    return q[..., :output_dim]


if __name__ == "__main__":
    B, S, H, OUT = 2, 16, 32, 4  # batch, state_dim, hidden_dim, output_dim (n actions)

    key = jax.random.PRNGKey(0)
    k_x, k_p = jax.random.split(key)
    state = jax.random.normal(k_x, (B, S), jnp.float32)

    # f32 path (tight correctness check, suits v5e elementwise units)
    params_f32 = init_params(k_p, S, H, OUT, dtype=jnp.float32)
    q = discrete_q_forward(state, params_f32, output_dim=OUT)
    jax.block_until_ready(q)
    assert q.shape == (B, OUT)
    q_ref = reference_forward(state, params_f32, OUT)
    assert jnp.allclose(q, q_ref, atol=1e-4, rtol=1e-4)

    # bf16 matmul-operand path (v6e/v7x perf feedback); accumulation stays f32 in-kernel.
    params_bf16 = init_params(k_p, S, H, OUT, dtype=jnp.bfloat16)
    q_bf16 = discrete_q_forward(state, params_bf16, output_dim=OUT)
    jax.block_until_ready(q_bf16)
    assert jnp.allclose(q_bf16, q_ref, atol=1e-1, rtol=1e-1)

    print("KERNEL_OK")
</pallas_src>

<mosaic_0001>
module attributes {stable_mosaic.version = 11 : i64} {
  func.func @_discrete_q_kernel(%arg0: i32, %arg1: memref<2x16xf32, #tpu.memory_space<vmem>>, %arg2: memref<16x32xf32, #tpu.memory_space<vmem>>, %arg3: memref<1x32xf32, #tpu.memory_space<vmem>>, %arg4: memref<32x32xf32, #tpu.memory_space<vmem>>, %arg5: memref<1x32xf32, #tpu.memory_space<vmem>>, %arg6: memref<32x32xf32, #tpu.memory_space<vmem>>, %arg7: memref<1x32xf32, #tpu.memory_space<vmem>>, %arg8: memref<32x128xf32, #tpu.memory_space<vmem>>, %arg9: memref<1x128xf32, #tpu.memory_space<vmem>>, %arg10: memref<2x128xf32, #tpu.memory_space<vmem>>) attributes {dimension_semantics = [#tpu.dimension_semantics<parallel>], iteration_bounds = array<i64: 1>, scalar_prefetch = 0 : i64, scratch_operands = 0 : i64, tpu.core_type = #tpu.core_type<tc>, window_params = [{transform_indices = @transform_0, window_bounds = array<i64: 2, 16>}, {pipeline_mode = #tpu.pipeline_mode<synchronous>, transform_indices = @transform_1, window_bounds = array<i64: 16, 32>}, {pipeline_mode = #tpu.pipeline_mode<synchronous>, transform_indices = @transform_2, window_bounds = array<i64: 1, 32>}, {pipeline_mode = #tpu.pipeline_mode<synchronous>, transform_indices = @transform_3, window_bounds = array<i64: 32, 32>}, {pipeline_mode = #tpu.pipeline_mode<synchronous>, transform_indices = @transform_4, window_bounds = array<i64: 1, 32>}, {pipeline_mode = #tpu.pipeline_mode<synchronous>, transform_indices = @transform_5, window_bounds = array<i64: 32, 32>}, {pipeline_mode = #tpu.pipeline_mode<synchronous>, transform_indices = @transform_6, window_bounds = array<i64: 1, 32>}, {pipeline_mode = #tpu.pipeline_mode<synchronous>, transform_indices = @transform_7, window_bounds = array<i64: 32, 128>}, {pipeline_mode = #tpu.pipeline_mode<synchronous>, transform_indices = @transform_8, window_bounds = array<i64: 1, 128>}, {transform_indices = @transform_9, window_bounds = array<i64: 2, 128>}]} {
    %c0 = arith.constant 0 : index
    %c0_0 = arith.constant 0 : index
    %0 = vector.load %arg1[%c0, %c0_0] : memref<2x16xf32, #tpu.memory_space<vmem>>, vector<2x16xf32>
    %c0_1 = arith.constant 0 : index
    %c0_2 = arith.constant 0 : index
    %1 = vector.load %arg2[%c0_1, %c0_2] : memref<16x32xf32, #tpu.memory_space<vmem>>, vector<16x32xf32>
    %cst = arith.constant dense<0.000000e+00> : vector<2x32xf32>
    %2 = tpu.matmul %0, %1, %cst {dimension_numbers = #tpu.dot_dimension_numbers<[1], [0], [0], [1], [0, 0, 1, 1], [], []>} : vector<2x16xf32>, vector<16x32xf32>, vector<2x32xf32> -> vector<2x32xf32>
    %c0_3 = arith.constant 0 : index
    %c0_4 = arith.constant 0 : index
    %3 = vector.load %arg3[%c0_3, %c0_4] : memref<1x32xf32, #tpu.memory_space<vmem>>, vector<1x32xf32>
    %4 = vector.broadcast %3 : vector<1x32xf32> to vector<2x32xf32>
    %5 = arith.addf %2, %4 : vector<2x32xf32>
    %cst_5 = arith.constant 0.000000e+00 : f32
    %6 = vector.broadcast %cst_5 : f32 to vector<2x32xf32>
    %7 = arith.maximumf %5, %6 : vector<2x32xf32>
    %c0_6 = arith.constant 0 : index
    %c0_7 = arith.constant 0 : index
    %8 = vector.load %arg4[%c0_6, %c0_7] : memref<32x32xf32, #tpu.memory_space<vmem>>, vector<32x32xf32>
    %cst_8 = arith.constant dense<0.000000e+00> : vector<2x32xf32>
    %9 = tpu.matmul %7, %8, %cst_8 {dimension_numbers = #tpu.dot_dimension_numbers<[1], [0], [0], [1], [0, 0, 1, 1], [], []>} : vector<2x32xf32>, vector<32x32xf32>, vector<2x32xf32> -> vector<2x32xf32>
    %c0_9 = arith.constant 0 : index
    %c0_10 = arith.constant 0 : index
    %10 = vector.load %arg5[%c0_9, %c0_10] : memref<1x32xf32, #tpu.memory_space<vmem>>, vector<1x32xf32>
    %11 = vector.broadcast %10 : vector<1x32xf32> to vector<2x32xf32>
    %12 = arith.addf %9, %11 : vector<2x32xf32>
    %cst_11 = arith.constant 0.000000e+00 : f32
    %13 = vector.broadcast %cst_11 : f32 to vector<2x32xf32>
    %14 = arith.maximumf %12, %13 : vector<2x32xf32>
    %c0_12 = arith.constant 0 : index
    %c0_13 = arith.constant 0 : index
    %15 = vector.load %arg6[%c0_12, %c0_13] : memref<32x32xf32, #tpu.memory_space<vmem>>, vector<32x32xf32>
    %cst_14 = arith.constant dense<0.000000e+00> : vector<2x32xf32>
    %16 = tpu.matmul %14, %15, %cst_14 {dimension_numbers = #tpu.dot_dimension_numbers<[1], [0], [0], [1], [0, 0, 1, 1], [], []>} : vector<2x32xf32>, vector<32x32xf32>, vector<2x32xf32> -> vector<2x32xf32>
    %c0_15 = arith.constant 0 : index
    %c0_16 = arith.constant 0 : index
    %17 = vector.load %arg7[%c0_15, %c0_16] : memref<1x32xf32, #tpu.memory_space<vmem>>, vector<1x32xf32>
    %18 = vector.broadcast %17 : vector<1x32xf32> to vector<2x32xf32>
    %19 = arith.addf %16, %18 : vector<2x32xf32>
    %cst_17 = arith.constant 0.000000e+00 : f32
    %20 = vector.broadcast %cst_17 : f32 to vector<2x32xf32>
    %21 = arith.maximumf %19, %20 : vector<2x32xf32>
    %c0_18 = arith.constant 0 : index
    %c0_19 = arith.constant 0 : index
    %22 = vector.load %arg8[%c0_18, %c0_19] : memref<32x128xf32, #tpu.memory_space<vmem>>, vector<32x128xf32>
    %cst_20 = arith.constant dense<0.000000e+00> : vector<2x128xf32>
    %23 = tpu.matmul %21, %22, %cst_20 {dimension_numbers = #tpu.dot_dimension_numbers<[1], [0], [0], [1], [0, 0, 1, 1], [], []>} : vector<2x32xf32>, vector<32x128xf32>, vector<2x128xf32> -> vector<2x128xf32>
    %c0_21 = arith.constant 0 : index
    %c0_22 = arith.constant 0 : index
    %24 = vector.load %arg9[%c0_21, %c0_22] : memref<1x128xf32, #tpu.memory_space<vmem>>, vector<1x128xf32>
    %25 = vector.broadcast %24 : vector<1x128xf32> to vector<2x128xf32>
    %26 = arith.addf %23, %25 : vector<2x128xf32>
    %c0_23 = arith.constant 0 : index
    %c0_24 = arith.constant 0 : index
    %27 = vector.load %arg10[%c0_23, %c0_24] : memref<2x128xf32, #tpu.memory_space<vmem>>, vector<2x128xf32>
    tpu.vector_store %arg10[%c0_23, %c0_24], %26 {strides = array<i32>} : memref<2x128xf32, #tpu.memory_space<vmem>>, vector<2x128xf32>,
    return
  }
  func.func @transform_0(%arg0: i32) -> (i32, i32) {
    %c0_i32 = arith.constant 0 : i32
    %c0_i32_0 = arith.constant 0 : i32
    return %arg0, %c0_i32 : i32, i32
  }
  func.func @transform_1(%arg0: i32) -> (i32, i32) {
    %c0_i32 = arith.constant 0 : i32
    %c0_i32_0 = arith.constant 0 : i32
    %c0_i32_1 = arith.constant 0 : i32
    return %c0_i32, %c0_i32_0 : i32, i32
  }
  func.func @transform_2(%arg0: i32) -> (i32, i32) {
    %c0_i32 = arith.constant 0 : i32
    %c0_i32_0 = arith.constant 0 : i32
    %c0_i32_1 = arith.constant 0 : i32
    return %c0_i32, %c0_i32_0 : i32, i32
  }
  func.func @transform_3(%arg0: i32) -> (i32, i32) {
    %c0_i32 = arith.constant 0 : i32
    %c0_i32_0 = arith.constant 0 : i32
    %c0_i32_1 = arith.constant 0 : i32
    return %c0_i32, %c0_i32_0 : i32, i32
  }
  func.func @transform_4(%arg0: i32) -> (i32, i32) {
    %c0_i32 = arith.constant 0 : i32
    %c0_i32_0 = arith.constant 0 : i32
    %c0_i32_1 = arith.constant 0 : i32
    return %c0_i32, %c0_i32_0 : i32, i32
  }
  func.func @transform_5(%arg0: i32) -> (i32, i32) {
    %c0_i32 = arith.constant 0 : i32
    %c0_i32_0 = arith.constant 0 : i32
    %c0_i32_1 = arith.constant 0 : i32
    return %c0_i32, %c0_i32_0 : i32, i32
  }
  func.func @transform_6(%arg0: i32) -> (i32, i32) {
    %c0_i32 = arith.constant 0 : i32
    %c0_i32_0 = arith.constant 0 : i32
    %c0_i32_1 = arith.constant 0 : i32
    return %c0_i32, %c0_i32_0 : i32, i32
  }
  func.func @transform_7(%arg0: i32) -> (i32, i32) {
    %c0_i32 = arith.constant 0 : i32
    %c0_i32_0 = arith.constant 0 : i32
    %c0_i32_1 = arith.constant 0 : i32
    return %c0_i32, %c0_i32_0 : i32, i32
  }
  func.func @transform_8(%arg0: i32) -> (i32, i32) {
    %c0_i32 = arith.constant 0 : i32
    %c0_i32_0 = arith.constant 0 : i32
    %c0_i32_1 = arith.constant 0 : i32
    return %c0_i32, %c0_i32_0 : i32, i32
  }
  func.func @transform_9(%arg0: i32) -> (i32, i32) {
    %c0_i32 = arith.constant 0 : i32
    %c0_i32_0 = arith.constant 0 : i32
    return %arg0, %c0_i32 : i32, i32
  }
}

</mosaic_0001>

<bundles_post_ra>
// kernel: discrete_q_forward.1
= control target key start
LH: loop header
LB: loop body
LE: loop exit
PB: predicated region body
PF: predicated region fallthrough
CT: control target
= control target key end

     0   :  { %14 = vsyncpa [#allocation3], 0  ;;  %s770_s0 = inlined_call_operand.hbm [shape: f32[2,16], index: 0, kind: input, shape index: {}]   ;;  %s771_s1 = inlined_call_operand.hbm [shape: f32[16,32], index: 1, kind: input, shape index: {}]   ;;  %s772_s2 = inlined_call_operand.vmem [shape: f32[1,32], index: 2, kind: input, shape index: {}]   ;;  %s773_s3 = inlined_call_operand.hbm [shape: f32[32,32], index: 3, kind: input, shape index: {}]   ;;  %s774_s4 = inlined_call_operand.vmem [shape: f32[1,32], index: 4, kind: input, shape index: {}]   ;;  %s775_s5 = inlined_call_operand.hbm [shape: f32[32,32], index: 5, kind: input, shape index: {}]   ;;  %s776_s6 = inlined_call_operand.vmem [shape: f32[1,32], index: 6, kind: input, shape index: {}]   ;;  %s777_s7 = inlined_call_operand.hbm [shape: f32[32,128], index: 7, kind: input, shape index: {}]   ;;  %s778_s8 = inlined_call_operand.vmem [shape: f32[1,128], index: 8, kind: input, shape index: {}]   ;;  %s779_s9 = inlined_call_operand.hbm [shape: f32[2,128], index: 9, kind: output, shape index: {}]  }
   0x1   :  { %15 = vsyncpa [#allocation6], 0 }
   0x2   :  { %16 = vsyncpa [#allocation9], 0 }
   0x3   :  { %17 = vsyncpa [#allocation4], 0  ;;  %s661_s30 = smov [#allocation5]  }
   0x4   :  { %s33_s10 = sshll.u32 %s661_s30, 4  ;;  %s34_s10 = int_to_ptr.vmem [resolvable:$true] %s33_s10 }
   0x5   :  { %s541_s11 = scalar_lea.vmem %s34_s10, 256  ;;  %p546_p1 = scmp.lt.s32.totalorder %s34_s10, %s34_s10 }
   0x6   :  { %p542_p0 = scmp.ne.s32.totalorder %s34_s10, %s541_s11  ;;  %p547_p2 = scmp.lt.s32.totalorder %s541_s11, %s541_s11 }
   0x8   :  { %p548_p3 = por %p547_p2, %p546_p1 }
   0xa   :  { %p549_p4 = pnand %p548_p3, %p542_p0 }
   0xc   :  { %552 = shalt.err (!%p549_p4)
}
   0xd   :  { %s662_s12 = smov 128   ;;  %s663_s13 = smov 8  }
   0xe   :  { %39 = dma.hbm_to_vmem [thread:$0]  %s771_s1, 256, %s34_s10, [#allocation6], %s662_s12, %s662_s12, %s663_s13  }
   0xf   :  { %s664_s16 = smov [#allocation8]   ;;  %s665_s18 = smov [#allocation2]  }
  0x10   :  { %s61_s17 = sshll.u32 %s664_s16, 4  ;;  %s24_s19 = sshll.u32 %s665_s18, 4  ;;  %s62_s17 = int_to_ptr.vmem [resolvable:$true] %s61_s17  ;;  %s25_s19 = int_to_ptr.vmem [resolvable:$true] %s24_s19 }
  0x11   :  { %s561_s20 = scalar_lea.vmem %s62_s17, 512  ;;  %p566_p6 = scmp.lt.s32.totalorder %s62_s17, %s62_s17 }
  0x12   :  { %p562_p5 = scmp.ne.s32.totalorder %s62_s17, %s561_s20  ;;  %p567_p7 = scmp.lt.s32.totalorder %s561_s20, %s561_s20 }
  0x14   :  { %p568_p8 = por %p567_p7, %p566_p6 }
  0x16   :  { %p569_p9 = pnand %p568_p8, %p562_p5 }
  0x18   :  { %572 = shalt.err (!%p569_p9)
}
  0x19   :  { %67 = dma.hbm_to_vmem [thread:$0]  %s775_s5, 512, %s62_s17, [#allocation9], %s662_s12, %s662_s12, %s663_s13  }
  0x1a   :  { %s581_s1 = scalar_lea.vmem %s25_s19, 32  ;;  %p586_p11 = scmp.lt.s32.totalorder %s25_s19, %s25_s19 }
  0x1b   :  { %p582_p10 = scmp.ne.s32.totalorder %s25_s19, %s581_s1  ;;  %p587_p12 = scmp.lt.s32.totalorder %s581_s1, %s581_s1 }
  0x1d   :  { %p588_p13 = por %p587_p12, %p586_p11 }
  0x1f   :  { %p589_p0 = pnand %p588_p13, %p582_p10 }
  0x21   :  { %592 = shalt.err (!%p589_p0)
}
  0x22   :  { %27 = dma.hbm_to_vmem [thread:$0]  %s770_s0, 32, %s25_s19, [#allocation3]  }
  0x23   :  { %s666_s25 = smov [#allocation7]   ;;  %s667_s27 = smov [#allocation10]  }
  0x24   :  { %s47_s26 = sshll.u32 %s666_s25, 4  ;;  %s75_s28 = sshll.u32 %s667_s27, 4  ;;  %s48_s26 = int_to_ptr.vmem [resolvable:$true] %s47_s26  ;;  %s76_s28 = int_to_ptr.vmem [resolvable:$true] %s75_s28 }
  0x25   :  { %s601_s29 = scalar_lea.vmem %s48_s26, 512  ;;  %p606_p2 = scmp.lt.s32.totalorder %s48_s26, %s48_s26 }
  0x26   :  { %p602_p1 = scmp.ne.s32.totalorder %s48_s26, %s601_s29  ;;  %p607_p3 = scmp.lt.s32.totalorder %s601_s29, %s601_s29 }
  0x28   :  { %p608_p4 = por %p607_p3, %p606_p2 }
  0x2a   :  { %p609_p5 = pnand %p608_p4, %p602_p1 }
  0x2c   :  { %612 = shalt.err (!%p609_p5)
}
  0x2d   :  { %53 = dma.hbm_to_vmem [thread:$0]  %s773_s3, 512, %s48_s26, [#allocation6], %s662_s12, %s662_s12, %s663_s13  }
  0x2e   :  { %s621_s0 = scalar_lea.vmem %s76_s28, 512  ;;  %p626_p7 = scmp.lt.s32.totalorder %s76_s28, %s76_s28 }
  0x2f   :  { %p622_p6 = scmp.ne.s32.totalorder %s76_s28, %s621_s0  ;;  %p627_p8 = scmp.lt.s32.totalorder %s621_s0, %s621_s0 }
  0x31   :  { %p628_p9 = por %p627_p8, %p626_p7 }
  0x33   :  { %p629_p10 = pnand %p628_p9, %p622_p6 }
  0x35   :  { %632 = shalt.err (!%p629_p10)
}
  0x36   :  { %81 = dma.hbm_to_vmem [thread:$0]  %s777_s7, 512, %s76_s28, [#allocation9], %s662_s12, %s662_s12, %s663_s13  }
  0x37   :  { %653 = dma.done.wait [#allocation3], 32  }
  0x38   :  { %654 = vsyncadd [#allocation3], 4294967264 }
  0x39   :  { %655 = dma.done.wait [#allocation6], 768  }
  0x3a   :  { %656 = vsyncadd [#allocation6], 4294966528 }
  0x3b   :  { %657 = dma.done.wait [#allocation9], 1024  }
  0x3c   :  { %658 = vsyncadd [#allocation9], 4294966272  ;;  %v668_v0 = vmov 0.0   ;;  %vm669_vm0 = vmmov 0   ;;  %v101_v1 = vld [vmem:[#allocation5 + $0x8] sm:$0xff]  ;;  %v100_v2 = vld [vmem:[#allocation5] sm:$0xff] }
  0x3d   :  { %483 = vmatprep.subr.mxu0 %v668_v0  ;;  %487 = vmatprep.mubr.msk.f32.mxu0 %vm669_vm0, %v668_v0  ;;  %v99_v3 = vld [vmem:[#allocation2] sm:$0x3]  ;;  %vm109_vm1 = vcmask 130048   ;;  %v187_v4 = vld [vmem:[#allocation7 + $0x18] sm:$0xff]  ;;  %v186_v5 = vld [vmem:[#allocation7 + $0x10] sm:$0xff]  ;;  %vm195_vm2 = vcmask 261120  }
  0x3e   :  { %490 = vmatprep.subr.mxu1 %v668_v0  ;;  %498 = vmatprep.mubr.msk.f32.mxu1 %vm669_vm0, %v668_v0  ;;  %v185_v6 = vld [vmem:[#allocation7 + $0x8] sm:$0xff]  ;;  %v184_v7 = vld [vmem:[#allocation7] sm:$0xff]  ;;  %v273_v8 = vld [vmem:[#allocation8 + $0x18] sm:$0xff]  ;;  %s670_s16 = smov [#allocation11]  }
  0x3f   :  { %484 = vmatpush3.msra.mxu0 %v101_v1  ;;  %491 = vmatpush3.msra.mxu1 %v187_v4  ;;  %v457_v9 = vld [vmem:[%s772_s2] ss:$0 sm:$0xff]  ;;  %v272_v14 = vld [vmem:[#allocation8 + $0x10] sm:$0xff]  ;;  %v270_v16 = vld [vmem:[#allocation8] sm:$0xff]  ;;  %s446_s17 = sshll.u32 %s670_s16, 4  ;;  %s447_s17 = int_to_ptr.vmem [resolvable:$true] %s446_s17 }
  0x40   :  { %485 = vmatprep.subr.mxu0 %v668_v0  ;;  %492 = vmatprep.subr.mxu1 %v668_v0  ;;  %v271_v15 = vld [vmem:[#allocation8 + $0x8] sm:$0xff]  ;;  %v358_v17 = vld [vmem:[#allocation10 + $0x18] sm:$0xff]  ;;  %v357_v23 = vld [vmem:[#allocation10 + $0x10] sm:$0xff]  ;;  %s633_s18 = scalar_lea.vmem %s447_s17, 32  ;;  %p638_p12 = scmp.lt.s32.totalorder %s447_s17, %s447_s17 }
  0x41   :  { %486 = vmatpush3.msra.mxu0 %v100_v2  ;;  %493 = vmatpush3.msra.mxu1 %v186_v5  ;;  %v459_v18 = vld [vmem:[%s774_s4] ss:$0 sm:$0xff]  ;;  %v355_v25 = vld [vmem:[#allocation10] sm:$0xff]  ;;  %p634_p11 = scmp.ne.s32.totalorder %s447_s17, %s633_s18  ;;  %p639_p13 = scmp.lt.s32.totalorder %s633_s18, %s633_s18 }
  0x42   :  { %488 = vmatmul.mubr.msk.f32.vlgmr.msra.gmra.mxu0 %vm109_vm1, %v99_v3  ;;  %501 = vmatprep.subr.mxu0 %v668_v0  ;;  %v356_v24 = vld [vmem:[#allocation10 + $0x8] sm:$0xff] }
  0x43   :  { %509 = vmatprep.mubr.msk.f32.mxu0 %vm669_vm0, %v668_v0  ;;  %494 = vmatprep.subr.mxu1 %v668_v0  ;;  %v461_v26 = vld [vmem:[%s776_s6] ss:$0 sm:$0xff]  ;;  %p640_p0 = por %p639_p13, %p638_p12 }
  0x44   :  { %495 = vmatpush3.msra.mxu1 %v185_v6  ;;  %502 = vmatpush3.msra.mxu0 %v273_v8  ;;  %v463_v31 = vld [vmem:[%s778_s8] ss:$0 sm:$0xff] }
  0x45   :  { %496 = vmatprep.subr.mxu1 %v668_v0  ;;  %503 = vmatprep.subr.mxu0 %v668_v0  ;;  %p641_p1 = pnand %p640_p0, %p634_p11 }
  0x46   :  { %497 = vmatpush3.msra.mxu1 %v184_v7  ;;  %504 = vmatpush3.msra.mxu0 %v272_v14 }
  0x47   :  { %512 = vmatprep.subr.mxu1 %v668_v0  ;;  %505 = vmatprep.subr.mxu0 %v668_v0 }
  0x48   :  { %506 = vmatpush3.msra.mxu0 %v271_v15 }
  0x49   :  { %507 = vmatprep.subr.mxu0 %v668_v0 }
  0x4a   :  { %508 = vmatpush3.msra.mxu0 %v270_v16 }
 0x102   :  { %v179_v10 = vpop.f32.mrf.mxu0 }
 0x103   :  { %v180_v11 = vadd.f32 %v457_v9, %v179_v10 }
 0x104   :  { %v489_v12 = vpop.f32.mrf.mxu0 }
 0x105   :  { %v183_v13 = vmax.f32 %v180_v11, 0.0 }
 0x107   :  { %499 = vmatmul.mubr.msk.f32.vlgmr.msra.gmra.mxu1 %vm195_vm2, %v183_v13 }
 0x108   :  { %520 = vmatprep.mubr.msk.f32.mxu1 %vm669_vm0, %v668_v0  ;;  %513 = vmatpush3.msra.mxu1 %v358_v17 }
 0x109   :  { %514 = vmatprep.subr.mxu1 %v668_v0 }
 0x10a   :  { %515 = vmatpush3.msra.mxu1 %v357_v23 }
 0x10b   :  { %516 = vmatprep.subr.mxu1 %v668_v0 }
 0x10c   :  { %517 = vmatpush3.msra.mxu1 %v356_v24 }
 0x10d   :  { %518 = vmatprep.subr.mxu1 %v668_v0 }
 0x10e   :  { %519 = vmatpush3.msra.mxu1 %v355_v25 }
 0x1c7   :  { %v265_v19 = vpop.f32.mrf.mxu1 }
 0x1c8   :  { %v266_v20 = vadd.f32 %v459_v18, %v265_v19 }
 0x1c9   :  { %v500_v21 = vpop.f32.mrf.mxu1 }
 0x1ca   :  { %v269_v22 = vmax.f32 %v266_v20, 0.0 }
 0x1cc   :  { %510 = vmatmul.mubr.msk.f32.vlgmr.msra.gmra.mxu0 %vm195_vm2, %v269_v22 }
 0x28c   :  { %v350_v27 = vpop.f32.mrf.mxu0 }
 0x28d   :  { %v351_v28 = vadd.f32 %v461_v26, %v350_v27 }
 0x28e   :  { %v511_v29 = vpop.f32.mrf.mxu0 }
 0x28f   :  { %v354_v30 = vmax.f32 %v351_v28, 0.0 }
 0x291   :  { %521 = vmatmul.mubr.msk.f32.vlgmr.msra.gmra.mxu1 %vm195_vm2, %v354_v30 }
 0x351   :  { %v435_v32 = vpop.f32.mrf.mxu1 }
 0x352   :  { %v436_v33 = vadd.f32 %v463_v31, %v435_v32 }
 0x353   :  { %v522_v34 = vpop.f32.mrf.mxu1 }
 0x354   :  { %439 = vst [vmem:[#allocation11] sm:$0x3] %v436_v33 }
 0x355   :  { %644 = shalt.err (!%p641_p1)
}
 0x356   :  { %449 = dma.vmem_to_hbm [thread:$0]  %s447_s17, 32, %s779_s9, [#allocation4]  }
 0x357   :  { %659 = dma.done.wait [#allocation4], 32  }
 0x358   :  { %660 = vsyncadd [#allocation4], 4294967264 }
 0x359   :  { %453 = vsyncpa [#allocation3], 1 }
 0x35a   :  { %454 = vsyncpa [#allocation6], 1 }
 0x35b   :  { %455 = vsyncpa [#allocation9], 1 }
 0x35c   :  { %456 = vsyncpa [#allocation4], 1 }

</bundles_post_ra>
